<compile_context>
chip_gen: v6e
topology: v6e:2x2x1
jax: 0.10.0
libtpu: 0.0.40
codegen_flags: <defaults>
</compile_context>

<pallas_src>
import jax
import jax.numpy as jnp
from jax.experimental import pallas as pl
from jax.experimental.pallas import tpu as pltpu


def _lane_pad(w):
    """Pad a feature width to the 128-lane multiple it occupies in VMEM."""
    return -(-w // 128) * 128


def _round_up(x, m):
    return -(-x // m) * m


def _make_concat_kernel(widths, residents, b_tile, sublane):
    """Build the kernel. refs = (*in_refs, out_ref).

    Tiled inputs arrive as (b_tile, F_i) blocks; resident (narrow) inputs
    arrive as full (padded_B, F_i) blocks and are row-sliced per grid step.
    """

    def kernel(*refs):
        in_refs = refs[:-1]
        out_ref = refs[-1]
        step = pl.program_id(0)
        # b_tile is a multiple of `sublane` whenever residents is non-empty,
        # so the dynamic sublane start is aligned.
        row0 = pl.multiple_of(step * b_tile, sublane)
        off = 0
        for idx, r in enumerate(in_refs):
            w = widths[idx]
            if idx in residents:
                val = r[pl.ds(row0, b_tile), :]
            else:
                val = r[...]
            # Static slice into the output tile; ragged widths (not multiples
            # of 128) lower to masked stores - unavoidable without changing
            # the module's packed output layout.
            out_ref[:, off:off + w] = val
            off += w

    return kernel


def concat(modalities, *, vmem_budget_bytes=None, force_kernel=False):
    """Pallas implementation of Concat.forward(modalities)."""
    # Glue: flatten each modality to (B, F_i) in plain JAX (pure reshape,
    # bit-identical to torch.flatten(start_dim=1) on contiguous tensors).
    flat = [jnp.reshape(m, (m.shape[0], -1)) for m in modalities]
    batch = flat[0].shape[0]
    widths = tuple(int(f.shape[1]) for f in flat)
    total = sum(widths)

    # TODO(synk): jnp.result_type promotion may differ from torch.cat for
    # exotic mixed-dtype modality lists; identical dtypes are unaffected.
    out_dtype = jnp.result_type(*[f.dtype for f in flat])
    flat = [f.astype(out_dtype) for f in flat]
    itemsize = jnp.dtype(out_dtype).itemsize

    # Small-input fallback: a single tiny grid step is dominated by the
    # pallas_call launch cost and the XLA fusion barrier.
    if not force_kernel and batch * total * itemsize < (1 << 20):
        return jnp.concatenate(flat, axis=1)

    # Generation-aware VMEM budget/limit.
    try:
        phys_vmem = int(pltpu.get_tpu_info().vmem_capacity_bytes)
    except Exception:
        phys_vmem = 64 * 1024 * 1024  # conservative: v7x per-TC VMEM
    if vmem_budget_bytes is None:
        vmem_budget_bytes = max(4 << 20, int(phys_vmem * 0.40))
    vmem_budget_bytes = min(int(vmem_budget_bytes), int(phys_vmem * 0.60))

    # Sublane multiple per dtype: 8 rows (4B), 16 rows (2B), 32 rows (1B).
    sublane = {4: 8, 2: 16, 1: 32}.get(itemsize, 8)
    b_rows_pad = _round_up(batch, sublane)

    # Classify sub-128-lane modalities as "resident" candidates: fetched once,
    # kept in VMEM across the whole grid, sliced per step.
    narrow_idx = [i for i, w in enumerate(widths) if w < 128]
    narrow_resident_bytes = sum(
        2 * b_rows_pad * _lane_pad(widths[i]) * itemsize for i in narrow_idx)
    residents = (set(narrow_idx)
                 if narrow_idx and narrow_resident_bytes <= vmem_budget_bytes // 4
                 else set())
    resident_bytes = sum(
        2 * b_rows_pad * _lane_pad(widths[i]) * itemsize for i in residents)

    tiled_idx = [i for i in range(len(widths)) if i not in residents]
    # Lane-padded, double-buffered per-row bytes for all batch-tiled arrays.
    per_row = 2 * itemsize * (sum(_lane_pad(widths[i]) for i in tiled_idx)
                              + _lane_pad(total))
    budget_rows = max(sublane, (vmem_budget_bytes - resident_bytes) // per_row)
    # v7x: keep >= 4 grid steps (>= 2 per TensorCore) when batch permits,
    # with a ~512-row floor (already ~85% of the HBM roofline).
    target_rows = max(512, _round_up(-(-batch // 4), sublane))
    b_tile = min(budget_rows, target_rows)
    b_tile = max(sublane, (b_tile // sublane) * sublane)

    if b_tile >= batch:
        # Single grid step: nothing to re-DMA, keep the plain tiled path.
        b_tile = batch
        residents = set()
        tiled_idx = list(range(len(widths)))
        grid_steps = 1
    else:
        grid_steps = -(-batch // b_tile)

    # Pad resident (narrow) arrays so the in-kernel row slice on the last
    # (partial) batch tile never reads out of bounds.
    padded_rows = grid_steps * b_tile
    inputs = []
    for i, f in enumerate(flat):
        if i in residents and padded_rows > batch:
            f = jnp.pad(f, ((0, padded_rows - batch), (0, 0)))
        inputs.append(f)

    in_specs = []
    for i, w in enumerate(widths):
        if i in residents:
            # Full array, constant block index -> fetched once, stays resident.
            in_specs.append(pl.BlockSpec((padded_rows, w), lambda i_: (0, 0)))
        else:
            in_specs.append(pl.BlockSpec((b_tile, w), lambda i_: (i_, 0)))
    out_spec = pl.BlockSpec((b_tile, total), lambda i_: (i_, 0))

    kernel = _make_concat_kernel(widths, frozenset(residents), b_tile, sublane)

    # Scoped VMEM limit derived from the actual padded, double-buffered
    # residency plus headroom; clamped under physical VMEM on every part.
    residency = (resident_bytes
                 + 2 * itemsize * b_tile * (sum(_lane_pad(widths[i]) for i in tiled_idx)
                                            + _lane_pad(total)))
    vmem_limit = min(int(phys_vmem * 0.90), int(residency) + (12 << 20))
    vmem_limit = max(vmem_limit, 16 << 20)

    return pl.pallas_call(
        kernel,
        out_shape=jax.ShapeDtypeStruct((batch, total), out_dtype),
        grid=(grid_steps,),
        in_specs=in_specs,
        out_specs=out_spec,
        compiler_params=pltpu.CompilerParams(
            # Distinct output block per batch tile -> safe to shard across
            # TensorCores on v7x; no effect on single-TC v5e/v6e.
            dimension_semantics=("parallel",),
            vmem_limit_bytes=int(vmem_limit),
        ),
    )(*inputs)


def _reference(modalities):
    return jnp.concatenate(
        [jnp.reshape(m, (m.shape[0], -1)) for m in modalities], axis=1
    )


if __name__ == "__main__":
    key = jax.random.PRNGKey(0)
    ks = jax.random.split(key, 9)

    # --- Test 1: module-spec shapes (batch=2): single grid step, all widths
    # ragged.  force_kernel=True so the Pallas path is exercised despite the
    # small-input fallback. ---
    x_img = jax.random.normal(ks[0], (2, 4, 16, 16), dtype=jnp.float32)  # NCHW conv feat
    x_vec = jax.random.normal(ks[1], (2, 8), dtype=jnp.float32)          # dense feat
    x_seq = jax.random.normal(ks[2], (2, 3, 5), dtype=jnp.float32)       # seq feat
    m1 = [x_img, x_vec, x_seq]
    out1 = jax.block_until_ready(concat(m1, force_kernel=True))
    ref1 = _reference(m1)
    assert out1.shape == ref1.shape, (out1.shape, ref1.shape)
    assert jnp.array_equal(out1, ref1), "Pallas concat mismatch (test 1)"

    # Fallback path sanity (same inputs, fallback allowed).
    out1b = jax.block_until_ready(concat(m1))
    assert jnp.array_equal(out1b, ref1), "Fallback concat mismatch (test 1b)"

    # --- Test 2: tiny explicit VMEM budget to force a multi-step batch-tiled
    # grid with every modality tiled (residents disabled by the budget gate).
    y_img = jax.random.normal(ks[3], (16, 4, 8, 8), dtype=jnp.float32)
    y_vec = jax.random.normal(ks[4], (16, 32), dtype=jnp.float32)
    y_seq = jax.random.normal(ks[5], (16, 3, 5), dtype=jnp.float32)
    m2 = [y_img, y_vec, y_seq]
    out2 = jax.block_until_ready(
        concat(m2, vmem_budget_bytes=2048, force_kernel=True))
    ref2 = _reference(m2)
    assert out2.shape == ref2.shape, (out2.shape, ref2.shape)
    assert jnp.array_equal(out2, ref2), "Pallas concat mismatch (test 2)"

    # --- Test 3: larger batch (not a multiple of the tile) so that
    #   * the grid has multiple steps,
    #   * narrow modalities take the VMEM-resident (fetch-once) path,
    #   * the last output tile is partial (masked writeback), and
    #   * the resident inputs are batch-padded in the wrapper. ---
    z_img = jax.random.normal(ks[6], (1000, 4, 8, 8), dtype=jnp.float32)
    z_vec = jax.random.normal(ks[7], (1000, 8), dtype=jnp.float32)
    z_seq = jax.random.normal(ks[8], (1000, 3, 5), dtype=jnp.float32)
    m3 = [z_img, z_vec, z_seq]
    out3 = jax.block_until_ready(concat(m3, force_kernel=True))
    ref3 = _reference(m3)
    assert out3.shape == ref3.shape, (out3.shape, ref3.shape)
    assert jnp.array_equal(out3, ref3), "Pallas concat mismatch (test 3)"

    print("KERNEL_OK")
</pallas_src>

<mosaic_0001>
module attributes {stable_mosaic.version = 11 : i64} {
  func.func @kernel(%arg0: i32, %arg1: memref<2x1024xf32, #tpu.memory_space<vmem>>, %arg2: memref<2x8xf32, #tpu.memory_space<vmem>>, %arg3: memref<2x15xf32, #tpu.memory_space<vmem>>, %arg4: memref<2x1047xf32, #tpu.memory_space<vmem>>) attributes {dimension_semantics = [#tpu.dimension_semantics<parallel>], iteration_bounds = array<i64: 1>, scalar_prefetch = 0 : i64, scratch_operands = 0 : i64, tpu.core_type = #tpu.core_type<tc>, window_params = [{transform_indices = @transform_0, window_bounds = array<i64: 2, 1024>}, {transform_indices = @transform_1, window_bounds = array<i64: 2, 8>}, {transform_indices = @transform_2, window_bounds = array<i64: 2, 15>}, {transform_indices = @transform_3, window_bounds = array<i64: 2, 1047>}]} {
    %c0 = arith.constant 0 : index
    %c0_0 = arith.constant 0 : index
    %0 = vector.load %arg1[%c0, %c0_0] : memref<2x1024xf32, #tpu.memory_space<vmem>>, vector<2x1024xf32>
    %c0_1 = arith.constant 0 : index
    %c0_2 = arith.constant 0 : index
    %1 = vector.load %arg4[%c0_1, %c0_2] : memref<2x1047xf32, #tpu.memory_space<vmem>>, vector<2x1024xf32>
    tpu.vector_store %arg4[%c0_1, %c0_2], %0 {strides = array<i32>} : memref<2x1047xf32, #tpu.memory_space<vmem>>, vector<2x1024xf32>,
    %c0_3 = arith.constant 0 : index
    %c0_4 = arith.constant 0 : index
    %2 = vector.load %arg2[%c0_3, %c0_4] : memref<2x8xf32, #tpu.memory_space<vmem>>, vector<2x8xf32>
    %c0_5 = arith.constant 0 : index
    %c1024 = arith.constant 1024 : index
    %3 = vector.load %arg4[%c0_5, %c1024] : memref<2x1047xf32, #tpu.memory_space<vmem>>, vector<2x8xf32>
    tpu.vector_store %arg4[%c0_5, %c1024], %2 {strides = array<i32>} : memref<2x1047xf32, #tpu.memory_space<vmem>>, vector<2x8xf32>,
    %c0_6 = arith.constant 0 : index
    %c0_7 = arith.constant 0 : index
    %4 = vector.load %arg3[%c0_6, %c0_7] : memref<2x15xf32, #tpu.memory_space<vmem>>, vector<2x15xf32>
    %c0_8 = arith.constant 0 : index
    %c1032 = arith.constant 1032 : index
    %5 = vector.load %arg4[%c0_8, %c1032] : memref<2x1047xf32, #tpu.memory_space<vmem>>, vector<2x15xf32>
    tpu.vector_store %arg4[%c0_8, %c1032], %4 {strides = array<i32>} : memref<2x1047xf32, #tpu.memory_space<vmem>>, vector<2x15xf32>,
    return
  }
  func.func @transform_0(%arg0: i32) -> (i32, i32) {
    %c0_i32 = arith.constant 0 : i32
    %c0_i32_0 = arith.constant 0 : i32
    return %arg0, %c0_i32 : i32, i32
  }
  func.func @transform_1(%arg0: i32) -> (i32, i32) {
    %c0_i32 = arith.constant 0 : i32
    %c0_i32_0 = arith.constant 0 : i32
    return %arg0, %c0_i32 : i32, i32
  }
  func.func @transform_2(%arg0: i32) -> (i32, i32) {
    %c0_i32 = arith.constant 0 : i32
    %c0_i32_0 = arith.constant 0 : i32
    return %arg0, %c0_i32 : i32, i32
  }
  func.func @transform_3(%arg0: i32) -> (i32, i32) {
    %c0_i32 = arith.constant 0 : i32
    %c0_i32_0 = arith.constant 0 : i32
    return %arg0, %c0_i32 : i32, i32
  }
}

</mosaic_0001>

<bundles_post_ra>
// kernel: tpu_custom_call.1
= control target key start
LH: loop header
LB: loop body
LE: loop exit
PB: predicated region body
PF: predicated region fallthrough
CT: control target
= control target key end

     0   :  { %8 = vsyncpa [#allocation3], 0  ;;  %s183_s0 = inlined_call_operand.hbm [shape: f32[2,1024], index: 0, kind: input, shape index: {}]   ;;  %s184_s1 = inlined_call_operand.hbm [shape: f32[2,8], index: 1, kind: input, shape index: {}]   ;;  %s185_s2 = inlined_call_operand.vmem [shape: f32[2,15], index: 2, kind: input, shape index: {}]   ;;  %s186_s3 = inlined_call_operand.hbm [shape: f32[2,1047], index: 3, kind: output, shape index: {}]  }
   0x1   :  { %9 = vsyncpa [#allocation6], 0 }
   0x2   :  { %10 = vsyncpa [#allocation4], 0  ;;  %s147_s12 = smov [#allocation2]   ;;  %s148_s14 = smov [#allocation5]  }
   0x3   :  { %s17_s13 = sshll.u32 %s147_s12, 4  ;;  %s27_s15 = sshll.u32 %s148_s14, 4  ;;  %s18_s13 = int_to_ptr.vmem [resolvable:$true] %s17_s13  ;;  %s28_s15 = int_to_ptr.vmem [resolvable:$true] %s27_s15 }
   0x4   :  { %s89_s16 = scalar_lea.vmem %s18_s13, 256  ;;  %p94_p1 = scmp.lt.s32.totalorder %s18_s13, %s18_s13 }
   0x5   :  { %p90_p0 = scmp.ne.s32.totalorder %s18_s13, %s89_s16  ;;  %p95_p2 = scmp.lt.s32.totalorder %s89_s16, %s89_s16 }
   0x7   :  { %p96_p3 = por %p95_p2, %p94_p1 }
   0x9   :  { %p97_p4 = pnand %p96_p3, %p90_p0 }
   0xb   :  { %100 = shalt.err (!%p97_p4)
}
   0xc   :  { %20 = dma.hbm_to_vmem [thread:$0]  %s183_s0, 256, %s18_s13, [#allocation3]  }
   0xd   :  { %s109_s19 = scalar_lea.vmem %s28_s15, 32  ;;  %p114_p6 = scmp.lt.s32.totalorder %s28_s15, %s28_s15 }
   0xe   :  { %p110_p5 = scmp.ne.s32.totalorder %s28_s15, %s109_s19  ;;  %p115_p7 = scmp.lt.s32.totalorder %s109_s19, %s109_s19 }
  0x10   :  { %p116_p8 = por %p115_p7, %p114_p6 }
  0x12   :  { %p117_p9 = pnand %p116_p8, %p110_p5 }
  0x14   :  { %120 = shalt.err (!%p117_p9)
}
  0x15   :  { %30 = dma.hbm_to_vmem [thread:$0]  %s184_s1, 32, %s28_s15, [#allocation6]  }
  0x16   :  { %141 = dma.done.wait [#allocation3], 256  }
  0x17   :  { %142 = vsyncadd [#allocation3], 4294967040 }
  0x18   :  { %143 = dma.done.wait [#allocation6], 32  }
  0x19   :  { %144 = vsyncadd [#allocation6], 4294967264  ;;  %vm44_vm0 = vcmask 58368   ;;  %v43_v1 = vld [vmem:[#allocation5] sm:$0x3]  ;;  %s149_s0 = smov 8  }
  0x1a   :  { %v76_v0 = vld.sshfl [vmem:[%s185_s2] sm:$0x3 pattern:$0x76325410]  ;;  %45 = vst.msk [vmem:[#allocation7 + $0x10] sm:$0x3] %vm44_vm0, %v43_v1 }
  0x1b   :  { %55 = vrot.lane.b32.xlu0 %v76_v0, %s149_s0  ;;  %v39_v2 = vld [vmem:[#allocation2] sm:$0xff]  ;;  %v40_v3 = vld [vmem:[#allocation2 + $0x8] sm:$0xff]  ;;  %s150_s24 = smov [#allocation7]   ;;  %vm58_vm1 = vcmask 181312  }
  0x1c   :  { %41 = vst [vmem:[#allocation7] sm:$0xff] %v39_v2  ;;  %42 = vst [vmem:[#allocation7 + $0x8] sm:$0xff] %v40_v3  ;;  %s66_s25 = sshll.u32 %s150_s24, 4  ;;  %s67_s25 = int_to_ptr.vmem [resolvable:$true] %s66_s25 }
  0x1d   :  { %s121_s1 = scalar_lea.vmem %s67_s25, 288  ;;  %p126_p11 = scmp.lt.s32.totalorder %s67_s25, %s67_s25 }
  0x1e   :  { %p122_p10 = scmp.ne.s32.totalorder %s67_s25, %s121_s1  ;;  %p127_p12 = scmp.lt.s32.totalorder %s121_s1, %s121_s1 }
  0x20   :  { %p128_p13 = por %p127_p12, %p126_p11 }
  0x22   :  { %p129_p0 = pnand %p128_p13, %p122_p10 }
  0x8d   :  { %v56_v4 = vpop.permute.xlu0 %55 }
  0x8e   :  { %59 = vst.msk [vmem:[#allocation7 + $0x10] sm:$0x3] %vm58_vm1, %v56_v4 }
  0x8f   :  { %132 = shalt.err (!%p129_p0)
}
  0x90   :  { %69 = dma.vmem_to_hbm [thread:$0]  %s67_s25, 288, %s186_s3, [#allocation4]  }
  0x91   :  { %145 = dma.done.wait [#allocation4], 288  }
  0x92   :  { %146 = vsyncadd [#allocation4], 4294967008 }
  0x93   :  { %73 = vsyncpa [#allocation3], 1 }
  0x94   :  { %74 = vsyncpa [#allocation6], 1 }
  0x95   :  { %75 = vsyncpa [#allocation4], 1 }

</bundles_post_ra>
